<compile_context>
chip_gen: v7x
topology: tpu7x:2x2x1
jax: 0.10.0
libtpu: 0.0.40
codegen_flags: <defaults>
</compile_context>

<pallas_src>
import random

import jax
import jax.numpy as jnp
from jax import lax
from jax.experimental import pallas as pl
from jax.experimental.pallas import tpu as pltpu

# ~2 MiB of int8 mask tile per grid step: >=85% of HBM roofline on v5e/v6e,
# and VMEM-safe on v7x (mask + rand tiles, double buffered ~= 8 MiB).
# TODO(synk): make this generation-aware via pltpu.get_tpu_info().
_TILE_BUDGET_BYTES = 2 << 20


def _largest_divisor_tile(h, max_t, step):
    """Largest multiple of `step` that divides h and is <= max_t (0 if none)."""
    t = min(max_t, (h // step) * step)
    while t >= step:
        if h % t == 0:
            return t
        t -= step
    return 0


def _choose_tiles(n, h, w, budget):
    """Pick (B candidates/block, TH rows/chunk) so B*TH*W int8 <= budget."""
    per_cand = h * w
    if per_cand <= budget:
        th = h                                   # full H per candidate
        b = min(n, max(1, budget // per_cand))
        while n % b != 0:                        # keep the grid exact: no N padding
            b -= 1
    else:
        b = 1
        # int8 packs 4 rows per sublane -> prefer multiple-of-32 row chunks.
        th = _largest_divisor_tile(h, max(32, (budget // w) // 32 * 32), 32)
        if th == 0:
            th = _largest_divisor_tile(h, max(8, (budget // w) // 8 * 8), 8)
        if th == 0:
            # TODO(synk): H has no 8-aligned divisor within budget; fall back to
            # one full-H block per candidate (raise vmem_limit for huge masks).
            th = h
    return b, th


def _shape_sampler_kernel(mask_ref, box_ref, rand_ref, keep_ref):
    """One (candidate-block, H-chunk) grid step.

    mask_ref : VMEM (B, TH, W) int8   candidate gt masks (0/1)
    box_ref  : VMEM (B, 1, 4)  int32  (x0, y0, x1, y1)
    rand_ref : VMEM (B, TH, W) int8   drawn shape (mask restricted to its box)
    keep_ref : VMEM (B, 1, 1)  int32  accumulated over H-chunks: >0 iff non-empty
    """
    c = pl.program_id(1)
    m = mask_ref[...]                               # (B, TH, W) int8
    bb = box_ref[...]                               # (B, 1, 4) int32
    x0 = bb[:, :, 0:1]                              # (B, 1, 1)
    y0 = bb[:, :, 1:2]
    x1 = bb[:, :, 2:3]
    y1 = bb[:, :, 3:4]

    th = m.shape[1]
    w = m.shape[2]
    rows = lax.broadcasted_iota(jnp.int32, (1, th, 1), 1) + c * th   # (1, TH, 1)
    cols = lax.broadcasted_iota(jnp.int32, (1, 1, w), 2)             # (1, 1, W)

    # Per-candidate row/col inside-box vectors (B*(TH+W) compares), combined
    # with a single broadcast AND + one select per pixel.
    row_in = (rows >= y0) & (rows < y1)             # (B, TH, 1)
    col_in = (cols >= x0) & (cols < x1)             # (B, 1, W)
    inside = row_in & col_in                        # (B, TH, W)

    # TODO(synk): the real shape-candidate classes (Point/Scribble/Polygon/...)
    # are external OpenCV host code; their draw(x, y) is simulated
    # deterministically as the gt mask restricted to its bounding box.
    rand = jnp.where(inside, m, jnp.zeros_like(m))  # (B, TH, W) int8
    rand_ref[...] = rand

    # Per-chunk non-empty test (OR via max), accumulated across H-chunks in the
    # resident keep block.
    # TODO(synk): switch to a pure int8 max-reduce once Mosaic int8
    # multi_reduction lowering is verified on v5e/v6e/v7x.
    chunk_keep = jnp.max(
        jnp.max(rand.astype(jnp.int32), axis=2, keepdims=True),
        axis=1, keepdims=True)                      # (B, 1, 1) int32

    @pl.when(c == 0)
    def _init():
        keep_ref[...] = jnp.zeros_like(keep_ref)

    keep_ref[...] = jnp.maximum(keep_ref[...], chunk_keep)


def _run_sampler_kernel(cand_masks_bool, cand_boxes_i32, H, W,
                        tile_budget=_TILE_BUDGET_BYTES):
    """cand_masks_bool: (n, H, W) bool; cand_boxes_i32: (n, 4) int32.

    Returns (rand_i8 (n, H, W), keep_i32 (n, 1, 1)).
    """
    n = cand_masks_bool.shape[0]
    B, TH = _choose_tiles(n, H, W, tile_budget)
    grid = (n // B, H // TH)

    # TODO(synk): feed the bool mask straight into the kernel (and emit bool)
    # once Mosaic bool-ref lowering is verified on all target generations.
    m_i8 = cand_masks_bool.astype(jnp.int8)          # (n, H, W)
    box3 = cand_boxes_i32.reshape(n, 1, 4)           # (n, 1, 4)

    tile_bytes = B * TH * W
    cost = pl.CostEstimate(
        flops=2 * n * H * W,
        transcendentals=0,
        bytes_accessed=2 * n * H * W + n * 16 + n * 4)

    rand_i8, keep_i32 = pl.pallas_call(
        _shape_sampler_kernel,
        grid=grid,
        in_specs=[
            pl.BlockSpec((B, TH, W), lambda i, c: (i, c, 0)),
            pl.BlockSpec((B, 1, 4), lambda i, c: (i, 0, 0)),
        ],
        out_specs=[
            pl.BlockSpec((B, TH, W), lambda i, c: (i, c, 0)),
            pl.BlockSpec((B, 1, 1), lambda i, c: (i, 0, 0)),
        ],
        out_shape=(
            jax.ShapeDtypeStruct((n, H, W), jnp.int8),
            jax.ShapeDtypeStruct((n, 1, 1), jnp.int32),
        ),
        compiler_params=pltpu.CompilerParams(
            dimension_semantics=("parallel", "arbitrary"),
            vmem_limit_bytes=int(min(max(4 * tile_bytes + (2 << 20), 32 << 20),
                                     64 << 20)),
        ),
        cost_estimate=cost,
    )(m_i8, box3)
    return rand_i8, keep_i32


class ShapeSampler:
    def __init__(self, max_candidate=1, shape_prob=(), shape_candidate=(),
                 is_train=True):
        self.max_candidate = max_candidate
        self.shape_prob = list(shape_prob)
        self.shape_candidate = list(shape_candidate)   # names stand in for classes
        self.is_train = is_train

    def forward(self, masks, boxes):
        """masks: (N, H, W) bool; boxes: (N, 4) float (x0, y0, x1, y1)."""
        H, W = masks.shape[-2:]
        if masks.shape[0] == 0:
            gt_masks = jnp.zeros((H, W), dtype=jnp.bool_)
            rand_masks = jnp.zeros((H, W), dtype=jnp.bool_)
            return {'gt_masks': gt_masks[None, :],
                    'rand_shape': jnp.stack([rand_masks]),
                    'types': ['none']}

        n_total = masks.shape[0]
        indices = list(range(n_total))
        if self.is_train:
            random.shuffle(indices)                 # host RNG, as in the spec
            sel = jnp.asarray(indices[:self.max_candidate], dtype=jnp.int32)
            candidate_mask = masks[sel]
            candidate_box = boxes[sel]
        else:
            candidate_mask = masks
            candidate_box = boxes

        n_cand = candidate_mask.shape[0]
        names = self.shape_candidate if self.shape_candidate else ['none']
        weights = None
        if (self.shape_prob and len(self.shape_prob) == len(names)
                and sum(self.shape_prob) > 0):
            weights = list(self.shape_prob)
        draw_funcs = random.choices(names, weights=weights, k=n_cand)
        types = [str(d) for d in draw_funcs]

        # ---- Pallas hot path: draw shapes + per-candidate non-empty test ----
        # TODO(synk): for the tiny-N training path (max_candidate=1-2), batch
        # candidates across images before calling the kernel.
        rand_i8, keep_i32 = _run_sampler_kernel(
            candidate_mask, jnp.round(candidate_box).astype(jnp.int32), H, W)

        keep = keep_i32.reshape(n_cand) > 0                 # (n,) bool, on device
        rand_shape = rand_i8 != 0                           # (n, H, W) bool
        # gt zeroing done here (single fused pass in XLA) instead of a second
        # full-size kernel output.
        gt_masks = jnp.where(keep[:, None, None], candidate_mask,
                             jnp.zeros_like(candidate_mask))

        # One tiny device->host sync (n scalars) for the `types` fix-up, issued
        # only after all device outputs have been enqueued.
        keep_host = jax.device_get(keep)
        types = [t if bool(k) else 'none' for t, k in zip(types, keep_host)]

        return {'gt_masks': gt_masks, 'rand_shape': rand_shape,
                'types': types, 'sampler': self}


if __name__ == "__main__":
    import numpy as np

    random.seed(0)

    def _reference_draw(masks_np, boxes_np):
        N, H, W = masks_np.shape
        rows = np.arange(H)[:, None]
        cols = np.arange(W)[None, :]
        rand = np.zeros_like(masks_np)
        keep = np.zeros((N,), dtype=bool)
        for i in range(N):
            x0, y0, x1, y1 = boxes_np[i]
            inside = (rows >= y0) & (rows < y1) & (cols >= x0) & (cols < x1)
            rand[i] = masks_np[i] & inside
            keep[i] = bool(rand[i].any())
        return rand, keep

    def _make_boxes(N, H, W):
        rows = []
        for i in range(N):
            if i == 0 and N > 2:
                rows.append([0.0, 0.0, 0.0, 0.0])        # empty box -> keep = 0
            else:
                rows.append([float(i % 3), float((2 * i) % 5),
                             float(W - (i % 4)), float(H - (i % 3))])
        return jnp.asarray(rows, dtype=jnp.float32)

    def _check_case(seed, N, H, W, budget):
        masks = jax.random.uniform(jax.random.PRNGKey(seed), (N, H, W)) > 0.6
        if N > 1:
            masks = masks.at[1].set(False)               # fully empty instance
        boxes_i = jnp.round(_make_boxes(N, H, W)).astype(jnp.int32)
        rand_i8, keep_i32 = _run_sampler_kernel(masks, boxes_i, H, W,
                                                tile_budget=budget)
        jax.block_until_ready(rand_i8)
        rand_k = np.asarray(rand_i8 != 0)
        keep_k = np.asarray(keep_i32.reshape(N) > 0)
        rand_ref, keep_ref = _reference_draw(np.asarray(masks),
                                             np.asarray(boxes_i))
        assert (rand_k == rand_ref).all(), f"rand mismatch N={N} H={H} W={W}"
        assert (keep_k == keep_ref).all(), f"keep mismatch N={N} H={H} W={W}"

    # Kernel checks across the tiling regimes:
    #   single block, multiple candidate blocks, multiple H-chunks (keep accum).
    _check_case(seed=0, N=3, H=16, W=16, budget=_TILE_BUDGET_BYTES)
    _check_case(seed=1, N=8, H=16, W=128, budget=4096)    # B=2  -> 4 candidate blocks
    _check_case(seed=2, N=2, H=64, W=128, budget=4096)    # TH=32 -> 2 H-chunks

    # ---- full forward pass of the module ----
    key = jax.random.PRNGKey(0)
    N, H, W = 3, 16, 16
    masks = jax.random.uniform(key, (N, H, W)) > 0.6          # bool gt masks
    masks = masks.at[1].set(False)                            # empty instance
    boxes = jnp.array([[2.0, 2.0, 12.0, 12.0],
                       [4.0, 4.0, 10.0, 10.0],
                       [0.0, 0.0, 16.0, 16.0]], dtype=jnp.float32)

    sampler = ShapeSampler(max_candidate=2,
                           shape_prob=[0.5, 0.5],
                           shape_candidate=['Polygon', 'Scribble'],
                           is_train=True)
    out = sampler.forward(masks, boxes)
    jax.block_until_ready(out['gt_masks'])
    jax.block_until_ready(out['rand_shape'])

    assert out['gt_masks'].dtype == jnp.bool_
    assert out['rand_shape'].dtype == jnp.bool_
    assert out['gt_masks'].shape == (2, H, W)
    assert out['rand_shape'].shape == (2, H, W)
    assert len(out['types']) == 2

    print("KERNEL_OK")
</pallas_src>

<mosaic_0001>
module attributes {stable_mosaic.version = 11 : i64} {
  func.func @_shape_sampler_kernel(%arg0: i32, %arg1: i32, %arg2: memref<3x16x16xi8, #tpu.memory_space<vmem>>, %arg3: memref<3x1x4xi32, #tpu.memory_space<vmem>>, %arg4: memref<3x16x16xi8, #tpu.memory_space<vmem>>, %arg5: memref<3x1x1xi32, #tpu.memory_space<vmem>>) attributes {dimension_semantics = [#tpu.dimension_semantics<parallel>, #tpu.dimension_semantics<arbitrary>], iteration_bounds = array<i64: 1, 1>, scalar_prefetch = 0 : i64, scratch_operands = 0 : i64, tpu.core_type = #tpu.core_type<tc>, window_params = [{transform_indices = @transform_0, window_bounds = array<i64: 3, 16, 16>}, {transform_indices = @transform_1, window_bounds = array<i64: 3, 1, 4>}, {transform_indices = @transform_2, window_bounds = array<i64: 3, 16, 16>}, {transform_indices = @transform_3, window_bounds = array<i64: 3, 1, 1>}]} {
    %c0 = arith.constant 0 : index
    %c0_0 = arith.constant 0 : index
    %c0_1 = arith.constant 0 : index
    %0 = vector.load %arg2[%c0, %c0_0, %c0_1] : memref<3x16x16xi8, #tpu.memory_space<vmem>>, vector<3x16x16xi8>
    %c0_2 = arith.constant 0 : index
    %c0_3 = arith.constant 0 : index
    %c0_4 = arith.constant 0 : index
    %1 = vector.load %arg3[%c0_2, %c0_3, %c0_4] : memref<3x1x4xi32, #tpu.memory_space<vmem>>, vector<3x1x4xi32>
    %2 = vector.extract_strided_slice %1 {offsets = [0, 0, 0], sizes = [3, 1, 1], strides = [1, 1, 1]} : vector<3x1x4xi32> to vector<3x1x1xi32>
    %3 = vector.extract_strided_slice %1 {offsets = [0, 0, 1], sizes = [3, 1, 1], strides = [1, 1, 1]} : vector<3x1x4xi32> to vector<3x1x1xi32>
    %4 = vector.extract_strided_slice %1 {offsets = [0, 0, 2], sizes = [3, 1, 1], strides = [1, 1, 1]} : vector<3x1x4xi32> to vector<3x1x1xi32>
    %5 = vector.extract_strided_slice %1 {offsets = [0, 0, 3], sizes = [3, 1, 1], strides = [1, 1, 1]} : vector<3x1x4xi32> to vector<3x1x1xi32>
    %6 = tpu.iota {dimensions = array<i32: 1>} : vector<1x16x1xi32>
    %c16_i32 = arith.constant 16 : i32
    %7 = arith.muli %arg1, %c16_i32 : i32
    %8 = vector.broadcast %7 : i32 to vector<1x16x1xi32>
    %9 = arith.addi %6, %8 : vector<1x16x1xi32>
    %10 = tpu.iota {dimensions = array<i32: 2>} : vector<1x1x16xi32>
    %11 = vector.broadcast %9 : vector<1x16x1xi32> to vector<3x16x1xi32>
    %12 = vector.broadcast %3 : vector<3x1x1xi32> to vector<3x16x1xi32>
    %13 = arith.cmpi sge, %11, %12 : vector<3x16x1xi32>
    %14 = vector.broadcast %9 : vector<1x16x1xi32> to vector<3x16x1xi32>
    %15 = vector.broadcast %5 : vector<3x1x1xi32> to vector<3x16x1xi32>
    %16 = arith.cmpi slt, %14, %15 : vector<3x16x1xi32>
    %17 = arith.andi %13, %16 : vector<3x16x1xi1>
    %18 = vector.broadcast %10 : vector<1x1x16xi32> to vector<3x1x16xi32>
    %19 = vector.broadcast %2 : vector<3x1x1xi32> to vector<3x1x16xi32>
    %20 = arith.cmpi sge, %18, %19 : vector<3x1x16xi32>
    %21 = vector.broadcast %10 : vector<1x1x16xi32> to vector<3x1x16xi32>
    %22 = vector.broadcast %4 : vector<3x1x1xi32> to vector<3x1x16xi32>
    %23 = arith.cmpi slt, %21, %22 : vector<3x1x16xi32>
    %24 = arith.andi %20, %23 : vector<3x1x16xi1>
    %25 = vector.broadcast %17 : vector<3x16x1xi1> to vector<3x16x16xi1>
    %26 = vector.broadcast %24 : vector<3x1x16xi1> to vector<3x16x16xi1>
    %27 = arith.andi %25, %26 : vector<3x16x16xi1>
    %c0_i8 = arith.constant 0 : i8
    %28 = vector.broadcast %c0_i8 : i8 to vector<3x16x16xi8>
    %29 = arith.select %27, %0, %28 : vector<3x16x16xi1>, vector<3x16x16xi8>
    %c0_5 = arith.constant 0 : index
    %c0_6 = arith.constant 0 : index
    %c0_7 = arith.constant 0 : index
    %30 = vector.load %arg4[%c0_5, %c0_6, %c0_7] : memref<3x16x16xi8, #tpu.memory_space<vmem>>, vector<3x16x16xi8>
    tpu.vector_store %arg4[%c0_5, %c0_6, %c0_7], %29 {strides = array<i32>} : memref<3x16x16xi8, #tpu.memory_space<vmem>>, vector<3x16x16xi8>,
    %31 = arith.extsi %29 : vector<3x16x16xi8> to vector<3x16x16xi32>
    %cst = arith.constant dense<-2147483648> : vector<3x16xi32>
    %32 = vector.multi_reduction <maxsi>, %31, %cst [2] : vector<3x16x16xi32> to vector<3x16xi32>
    %33 = vector.shape_cast %32 : vector<3x16xi32> to vector<3x16x1xi32>
    %cst_8 = arith.constant dense<-2147483648> : vector<3x1xi32>
    %34 = vector.multi_reduction <maxsi>, %33, %cst_8 [1] : vector<3x16x1xi32> to vector<3x1xi32>
    %35 = vector.shape_cast %34 : vector<3x1xi32> to vector<3x1x1xi32>
    %c0_i32 = arith.constant 0 : i32
    %36 = arith.cmpi eq, %arg1, %c0_i32 : i32
    %37 = arith.extui %36 : i1 to i32
    %c0_i32_9 = arith.constant 0 : i32
    %38 = arith.cmpi ne, %37, %c0_i32_9 : i32
    scf.if %38 {
      %c0_i32_16 = arith.constant 0 : i32
      %42 = vector.broadcast %c0_i32_16 : i32 to vector<3x1x1xi32>
      %c0_17 = arith.constant 0 : index
      %c0_18 = arith.constant 0 : index
      %c0_19 = arith.constant 0 : index
      %43 = vector.load %arg5[%c0_17, %c0_18, %c0_19] : memref<3x1x1xi32, #tpu.memory_space<vmem>>, vector<3x1x1xi32>
      tpu.vector_store %arg5[%c0_17, %c0_18, %c0_19], %42 {strides = array<i32>} : memref<3x1x1xi32, #tpu.memory_space<vmem>>, vector<3x1x1xi32>,
    } else {
    }
    %c0_10 = arith.constant 0 : index
    %c0_11 = arith.constant 0 : index
    %c0_12 = arith.constant 0 : index
    %39 = vector.load %arg5[%c0_10, %c0_11, %c0_12] : memref<3x1x1xi32, #tpu.memory_space<vmem>>, vector<3x1x1xi32>
    %40 = arith.maxsi %39, %35 : vector<3x1x1xi32>
    %c0_13 = arith.constant 0 : index
    %c0_14 = arith.constant 0 : index
    %c0_15 = arith.constant 0 : index
    %41 = vector.load %arg5[%c0_13, %c0_14, %c0_15] : memref<3x1x1xi32, #tpu.memory_space<vmem>>, vector<3x1x1xi32>
    tpu.vector_store %arg5[%c0_13, %c0_14, %c0_15], %40 {strides = array<i32>} : memref<3x1x1xi32, #tpu.memory_space<vmem>>, vector<3x1x1xi32>,
    return
  }
  func.func @transform_0(%arg0: i32, %arg1: i32) -> (i32, i32, i32) {
    %c0_i32 = arith.constant 0 : i32
    %c0_i32_0 = arith.constant 0 : i32
    return %arg0, %arg1, %c0_i32 : i32, i32, i32
  }
  func.func @transform_1(%arg0: i32, %arg1: i32) -> (i32, i32, i32) {
    %c0_i32 = arith.constant 0 : i32
    %c0_i32_0 = arith.constant 0 : i32
    %c0_i32_1 = arith.constant 0 : i32
    return %arg0, %c0_i32, %c0_i32_0 : i32, i32, i32
  }
  func.func @transform_2(%arg0: i32, %arg1: i32) -> (i32, i32, i32) {
    %c0_i32 = arith.constant 0 : i32
    %c0_i32_0 = arith.constant 0 : i32
    return %arg0, %arg1, %c0_i32 : i32, i32, i32
  }
  func.func @transform_3(%arg0: i32, %arg1: i32) -> (i32, i32, i32) {
    %c0_i32 = arith.constant 0 : i32
    %c0_i32_0 = arith.constant 0 : i32
    %c0_i32_1 = arith.constant 0 : i32
    return %arg0, %c0_i32, %c0_i32_0 : i32, i32, i32
  }
}

</mosaic_0001>

<bundles_post_ra>
// kernel: tpu_custom_call.1
= control target key start
LH: loop header
LB: loop body
LE: loop exit
PB: predicated region body
PF: predicated region fallthrough
CT: control target
= control target key end

     0   :  { %9 = vsyncpa [#allocation3], 0  ;;  %s691_s0 = inlined_call_operand.hbm [shape: s8[3,16,16], index: 0, kind: input, shape index: {}]   ;;  %s692_s1 = inlined_call_operand.vmem [shape: s32[3,1,4], index: 1, kind: input, shape index: {}]   ;;  %s693_s2 = inlined_call_operand.hbm [shape: s8[3,16,16], index: 2, kind: output, shape index: {0}]   ;;  %s694_s3 = inlined_call_operand.vmem [shape: s32[3,1,1], index: 3, kind: output, shape index: {1}]  }
   0x1   :  { %10 = vsyncpa [#allocation4], 0  ;;  %s453_s12 = smov [#allocation2]   ;;  %s405_s16 = scalar_lea.hbm %s691_s0, 192 }
   0x2   :  { %s16_s13 = sshll.u32 %s453_s12, 4  ;;  %p406_p0 = scmp.ne.s32.totalorder %s691_s0, %s405_s16  ;;  %s17_s13 = int_to_ptr.vmem [resolvable:$true] %s16_s13 }
   0x3   :  { %p409_p1 = scmp.lt.u32.totalorder %s405_s16, %s691_s0 }
   0x5   :  { %p411_p2 = pnand %p409_p1, %p406_p0 }
   0x7   :  { %414 = shalt.err (!%p411_p2)
}
   0x8   :  { %s415_s21 = scalar_lea.vmem %s17_s13, 192  ;;  %p420_p4 = scmp.lt.s32.totalorder %s17_s13, %s17_s13 }
   0x9   :  { %p416_p3 = scmp.ne.s32.totalorder %s17_s13, %s415_s21  ;;  %p421_p5 = scmp.lt.s32.totalorder %s415_s21, %s415_s21 }
   0xb   :  { %p422_p6 = por %p421_p5, %p420_p4 }
   0xd   :  { %p423_p7 = pnand %p422_p6, %p416_p3 }
   0xf   :  { %426 = shalt.err (!%p423_p7)
}
  0x10   :  { %s454_s22 = smov 32   ;;  %s455_s23 = smov 2  }
  0x11   :  { %22 = dma.hbm_to_vmem [thread:$0]  %s691_s0, 192, %s17_s13, [#allocation3], %s454_s22, %s454_s22, %s455_s23  }
  0x12   :  { %449 = dma.done.wait [#allocation3], 192  }
  0x13   :  { %450 = vsyncadd [#allocation3], 4294967104  ;;  %v38_v0 = vlaneseq  ;;  %v456_v1 = vmov 0   ;;  %v36_v5 = vld [vmem:[%s692_s1 + $0x1] sm:$0x1]  ;;  %s457_s4 = smov 126  }
  0x14   :  { %400 = vset.pattern.permute.xlu1 %v456_v1  ;;  %399 = vset.pattern.permute.xlu0 %v456_v1  ;;  %v35_v6 = vld [vmem:[%s692_s1] sm:$0x1]  ;;  %v37_v7 = vld [vmem:[%s692_s1 + $0x2] sm:$0x1]  ;;  %v458_v17 = vmov 2   ;;  %v459_v18 = vmov 1  }
  0x15   :  { %v499_v2 = vshrl.u32 %v38_v0, 7  ;;  %v46_v38 = vand.u32 127, %v38_v0  ;;  %v29_v49 = vld [vmem:[#allocation2] sm:$0x3]  ;;  %v30_v56 = vld [vmem:[#allocation2 + $0x2] sm:$0x3] }
  0x16   :  { %v32_v60 = vld [vmem:[#allocation2 + $0x6] sm:$0x3]  ;;  %s460_s10 = smov [#allocation5]  }
  0x17   :  { %v502_v3 = vsub.s32 0, %v499_v2  ;;  %v505_v4 = vadd.s32 8, %v499_v2  ;;  %s375_s11 = sshll.u32 %s460_s10, 4  ;;  %s376_s11 = int_to_ptr.vmem [resolvable:$true] %s375_s11 }
  0x18   :  { %s427_s12 = scalar_lea.vmem %s376_s11, 192  ;;  %p432_p9 = scmp.lt.s32.totalorder %s376_s11, %s376_s11 }
  0x19   :  { %v54_v8 = vrot.slane %v36_v5, %v502_v3  ;;  %v50_v9 = vrot.slane %v35_v6, %v502_v3  ;;  %v58_v10 = vrot.slane %v37_v7, %v502_v3  ;;  %p428_p8 = scmp.ne.s32.totalorder %s376_s11, %s427_s12  ;;  %p433_p10 = scmp.lt.s32.totalorder %s427_s12, %s427_s12 }
  0x1b   :  { %vm67_vm0 = vcmp.lt.s32.totalorder %v499_v2, %v54_v8  ;;  %vm65_vm1 = vcmp.lt.s32.totalorder %v499_v2, %v50_v9  ;;  %vm68_vm2 = vcmp.lt.s32.totalorder %v505_v4, %v54_v8  ;;  %vm66_vm3 = vcmp.lt.s32.totalorder %v505_v4, %v50_v9  ;;  %p434_p11 = por %p433_p10, %p432_p9 }
  0x1c   :  { %v73_v11 = vsel %vm67_vm0, 1, %v456_v1  ;;  %v71_v12 = vsel %vm65_vm1, 1, %v456_v1  ;;  %v74_v13 = vsel %vm68_vm2, 1, %v456_v1  ;;  %vm61_vm4 = vcmp.ge.s32.totalorder %v499_v2, %v54_v8 }
  0x1d   :  { %81 = vrot.lane.b32.xlu1 %v73_v11, %s457_s4  ;;  %77 = vrot.lane.b32.xlu0 %v71_v12, %s457_s4  ;;  %v72_v14 = vsel %vm66_vm3, 1, %v456_v1  ;;  %vm70_vm5 = vcmp.lt.s32.totalorder %v505_v4, %v58_v10  ;;  %vm59_vm6 = vcmp.ge.s32.totalorder %v499_v2, %v50_v9  ;;  %vm62_vm7 = vcmp.ge.s32.totalorder %v505_v4, %v54_v8  ;;  %p435_p12 = pnand %p434_p11, %p428_p8 }
  0x1e   :  { %vm69_vm8 = vcmp.lt.s32.totalorder %v499_v2, %v58_v10  ;;  %vm60_vm9 = vcmp.ge.s32.totalorder %v505_v4, %v50_v9  ;;  %vm64_vm10 = vcmp.ge.s32.totalorder %v505_v4, %v58_v10  ;;  %vm63_vm11 = vcmp.ge.s32.totalorder %v499_v2, %v58_v10  ;;  %v34_v9 = vld [vmem:[#allocation2 + $0xa] sm:$0x3] }
  0x1f   :  { %v76_v15 = vsel %vm70_vm5, 1, %v456_v1  ;;  %v75_v16 = vsel %vm69_vm8, 1, %v456_v1 }
  0x21   :  { %83 = vrot.lane.b32.xlu1 %v74_v13, %s457_s4  ;;  %79 = vrot.lane.b32.xlu0 %v72_v14, %s457_s4 }
  0x25   :  { %87 = vrot.lane.b32.xlu1 %v76_v15, %s457_s4  ;;  %85 = vrot.lane.b32.xlu0 %v75_v16, %s457_s4  ;;  %v33_v15 = vld [vmem:[#allocation2 + $0x8] sm:$0x3] }
  0x29   :  { %109 = vperm.xlu1 %400, %v36_v5   ;;  %102 = vperm.xlu0 %399, %v35_v6  }
  0x2d   :  { %116 = vperm.xlu1 %400, %v37_v7   ;;  %401 = vset.pattern.permute.xlu0 %v458_v17 }
  0x2e   :  { %126 = vperm.xlu0 %401, %v35_v6  }
  0x31   :  { %402 = vset.pattern.permute.xlu1 %v458_v17 }
  0x32   :  { %133 = vperm.xlu1 %402, %v36_v5   ;;  %403 = vset.pattern.permute.xlu0 %v459_v18 }
  0x36   :  { %140 = vperm.xlu1 %402, %v37_v7  }
  0x3a   :  { %404 = vset.pattern.permute.xlu1 %v459_v18 }
  0x8f   :  { %v82_v19 = vpop.permute.xlu1 %81  ;;  %v78_v20 = vpop.permute.xlu0 %77 }
  0x90   :  { %vm89_vm12 = vcmp.ne.s32.totalorder %v78_v20, 0  ;;  %vm91_vm0 = vcmp.ne.s32.totalorder %v82_v19, 0 }
  0x91   :  { %vm95_vm13 = vmand %vm59_vm6, %vm89_vm12 }
  0x92   :  { %v152_v23 = vsel %vm95_vm13, 1, %v456_v1  ;;  %vm97_vm3 = vmand %vm61_vm4, %vm91_vm0 }
  0x93   :  { %v84_v21 = vpop.permute.xlu1 %83  ;;  %v80_v22 = vpop.permute.xlu0 %79  ;;  %159 = vperm.xlu0 %403, %v152_v23   ;;  %v154_v29 = vsel %vm97_vm3, 1, %v456_v1 }
  0x94   :  { %vm92_vm14 = vcmp.ne.s32.totalorder %v84_v21, 0  ;;  %vm90_vm15 = vcmp.ne.s32.totalorder %v80_v22, 0 }
  0x95   :  { %vm98_vm1 = vmand %vm62_vm7, %vm92_vm14 }
  0x96   :  { %vm96_vm2 = vmand %vm60_vm9, %vm90_vm15  ;;  %v155_v24 = vsel %vm98_vm1, 1, %v456_v1  ;;  %vm212_vm1 = vcmask 123904  }
  0x97   :  { %v88_v25 = vpop.permute.xlu1 %87  ;;  %v153_v26 = vsel %vm96_vm2, 1, %v456_v1  ;;  %v86_v27 = vpop.permute.xlu0 %85  ;;  %168 = vperm.xlu0 %403, %v155_v24  }
  0x98   :  { %vm94_vm5 = vcmp.ne.s32.totalorder %v88_v25, 0  ;;  %162 = vperm.xlu1 %404, %v153_v26   ;;  %vm93_vm6 = vcmp.ne.s32.totalorder %v86_v27, 0 }
  0x99   :  { %vm100_vm8 = vmand %vm64_vm10, %vm94_vm5 }
  0x9a   :  { %vm99_vm7 = vmand %vm63_vm11, %vm93_vm6  ;;  %v157_v28 = vsel %vm100_vm8, 1, %v456_v1  ;;  %vm225_vm8 = vcmask 130048  }
  0x9b   :  { %174 = vperm.xlu0 %403, %v157_v28   ;;  %v156_v30 = vsel %vm99_vm7, 1, %v456_v1 }
  0x9c   :  { %165 = vperm.xlu1 %404, %v154_v29  }
  0xa0   :  { %171 = vperm.xlu1 %404, %v156_v30  }
  0xa8   :  { %v110_v31 = vpop.permute.xlu1 %109  ;;  %v103_v33 = vpop.permute.xlu0 %102 }
  0xa9   :  { %v107_v36 = vrot.slane %v103_v33, %v502_v3  ;;  %v114_v40 = vrot.slane %v110_v31, %v502_v3 }
  0xab   :  { %vm560_vm4 = vcmp.ge.s32.totalorder %v46_v38, %v107_v36  ;;  %vm574_vm12 = vcmp.ge.s32.totalorder %v46_v38, %v114_v40 }
  0xac   :  { %v117_v32 = vpop.permute.xlu1 %116 }
  0xad   :  { %v127_v35 = vpop.permute.xlu0 %126  ;;  %v121_v44 = vrot.slane %v117_v32, %v502_v3 }
  0xae   :  { %v131_v37 = vrot.slane %v127_v35, %v502_v3 }
  0xaf   :  { %vm587_vm15 = vcmp.ge.s32.totalorder %v46_v38, %v121_v44 }
  0xb0   :  { %vm564_vm9 = vcmp.lt.s32.totalorder %v46_v38, %v131_v37 }
  0xb1   :  { %v134_v34 = vpop.permute.xlu1 %133  ;;  %vm149_vm10 = vmand %vm560_vm4, %vm564_vm9 }
  0xb2   :  { %v138_v41 = vrot.slane %v134_v34, %v502_v3 }
  0xb4   :  { %vm578_vm13 = vcmp.lt.s32.totalorder %v46_v38, %v138_v41 }
  0xb5   :  { %v141_v39 = vpop.permute.xlu1 %140  ;;  %vm150_vm6 = vmand %vm574_vm12, %vm578_vm13 }
  0xb6   :  { %v145_v45 = vrot.slane %v141_v39, %v502_v3  ;;  %v31_v3 = vld [vmem:[#allocation2 + $0x4] sm:$0x3] }
  0xb8   :  { %vm591_vm0 = vcmp.lt.s32.totalorder %v46_v38, %v145_v45 }
 0x112   :  { %v160_v46 = vpop.permute.xlu0 %159 }
 0x113   :  { %vm176_vm11 = vcmp.eq.s32.totalorder %v160_v46, 1 }
 0x114   :  { %vm188_vm14 = vmand %vm176_vm11, %vm149_vm10 }
 0x115   :  { %vm194_vm2 = vmpackc.low %vm188_vm14, %vm188_vm14 }
 0x116   :  { %vm195_vm3 = vmpackc.even %vm194_vm2, %vm194_vm2  ;;  %v169_v53 = vpop.permute.xlu0 %168 }
 0x117   :  { %v163_v52 = vpop.permute.xlu1 %162  ;;  %v206_v54 = vsel %vm195_vm3, %v29_v49, 0  ;;  %vm179_vm11 = vcmp.eq.s32.totalorder %v169_v53, 1  ;;  %vm151_vm14 = vmand %vm587_vm15, %vm591_vm0 }
 0x118   :  { %vm177_vm5 = vcmp.eq.s32.totalorder %v163_v52, 1  ;;  %213 = vst.msk [vmem:[#allocation5] sm:$0x3] %vm212_vm1, %v206_v54  ;;  %v219_v55 = vunpack.c.0.s8 %v206_v54  ;;  %vm191_vm4 = vmand %vm179_vm11, %vm150_vm6 }
 0x119   :  { %vm189_vm7 = vmand %vm177_vm5, %vm149_vm10 }
 0x11a   :  { %vm196_vm2 = vmpackc.low %vm189_vm7, %vm189_vm7  ;;  %v226_v58 = vsel %vm225_vm8, %v219_v55, 2147483648  ;;  %v175_v61 = vpop.permute.xlu0 %174 }
 0x11b   :  { %vm197_vm3 = vmpackc.even %vm196_vm2, %vm196_vm2  ;;  %v166_v57 = vpop.permute.xlu1 %165  ;;  %v228_v62 = vshra.s32 %v226_v58, 16  ;;  %vm181_vm2 = vcmp.eq.s32.totalorder %v175_v61, 1  ;;  %v227_v29 = vand.u32 65535, %v226_v58 }
 0x11c   :  { %v207_v59 = vsel %vm197_vm3, %v30_v56, 0  ;;  %vm178_vm9 = vcmp.eq.s32.totalorder %v166_v57, 1  ;;  %vm200_vm10 = vmpackc.low %vm191_vm4, %vm191_vm4 }
 0x11d   :  { %214 = vst.msk [vmem:[#allocation5 + $0x2] sm:$0x3] %vm212_vm1, %v207_v59  ;;  %v220_v63 = vunpack.c.0.s8 %v207_v59  ;;  %vm201_vm5 = vmpackc.even %vm200_vm10, %vm200_vm10  ;;  %v230_v0 = vcvt.s32.f32 %v228_v62  ;;  %v229_v31 = vcvt.s32.f32 %v227_v29 }
 0x11e   :  { %v209_v2 = vsel %vm201_vm5, %v32_v60, 0  ;;  %vm190_vm7 = vmand %vm178_vm9, %vm150_vm6 }
 0x11f   :  { %v172_v4 = vpop.permute.xlu1 %171  ;;  %v241_v5 = vsel %vm225_vm8, %v220_v63, 2147483648  ;;  %216 = vst.msk [vmem:[#allocation5 + $0x6] sm:$0x3] %vm212_vm1, %v209_v2  ;;  %v222_v6 = vunpack.c.0.s8 %v209_v2  ;;  %vm198_vm11 = vmpackc.low %vm190_vm7, %vm190_vm7  ;;  %231 = vmax.xlane.f32.xlu1 %v230_v0 }
 0x120   :  { %v243_v7 = vshra.s32 %v241_v5, 16  ;;  %vm199_vm3 = vmpackc.even %vm198_vm11, %vm198_vm11  ;;  %vm180_vm13 = vcmp.eq.s32.totalorder %v172_v4, 1  ;;  %v242_v32 = vand.u32 65535, %v241_v5 }
 0x121   :  { %v208_v8 = vsel %vm199_vm3, %v31_v3, 0  ;;  %vm193_vm12 = vmand %vm181_vm2, %vm151_vm14  ;;  %v271_v11 = vsel %vm225_vm8, %v222_v6, 2147483648  ;;  %vm353_vm2 = vcmask 0  }
 0x122   :  { %v245_v10 = vcvt.s32.f32 %v243_v7  ;;  %215 = vst.msk [vmem:[#allocation5 + $0x4] sm:$0x3] %vm212_vm1, %v208_v8  ;;  %v221_v12 = vunpack.c.0.s8 %v208_v8  ;;  %vm204_vm6 = vmpackc.low %vm193_vm12, %vm193_vm12  ;;  %v273_v13 = vshra.s32 %v271_v11, 16  ;;  %v244_v35 = vcvt.s32.f32 %v242_v32 }
 0x123   :  { %vm205_vm4 = vmpackc.even %vm204_vm6, %vm204_vm6  ;;  %v272_v36 = vand.u32 65535, %v271_v11  ;;  %354 = vst.msk [vmem:[%s694_s3] sm:$0x1] %vm353_vm2, %v456_v1 }
 0x124   :  { %246 = vmax.xlane.f32.xlu0 %v245_v10  ;;  %v211_v14 = vsel %vm205_vm4, %v34_v9, 0  ;;  %vm192_vm9 = vmand %vm180_vm13, %vm151_vm14  ;;  %v275_v16 = vcvt.s32.f32 %v273_v13  ;;  %v256_v17 = vsel %vm225_vm8, %v221_v12, 2147483648  ;;  %355 = vst.msk [vmem:[%s694_s3 + $0x1] sm:$0x1] %vm353_vm2, %v456_v1 }
 0x125   :  { %218 = vst.msk [vmem:[#allocation5 + $0xa] sm:$0x3] %vm212_vm1, %v211_v14  ;;  %v224_v18 = vunpack.c.0.s8 %v211_v14  ;;  %vm202_vm10 = vmpackc.low %vm192_vm9, %vm192_vm9  ;;  %v258_v19 = vshra.s32 %v256_v17, 16  ;;  %v257_v38 = vand.u32 65535, %v256_v17  ;;  %v274_v40 = vcvt.s32.f32 %v272_v36 }
 0x126   :  { %vm203_vm5 = vmpackc.even %vm202_vm10, %vm202_vm10  ;;  %276 = vmax.xlane.f32.xlu1 %v275_v16  ;;  %356 = vst.msk [vmem:[%s694_s3 + $0x2] sm:$0x1] %vm353_vm2, %v456_v1 }
 0x127   :  { %v210_v20 = vsel %vm203_vm5, %v33_v15, 0  ;;  %v260_v21 = vcvt.s32.f32 %v258_v19  ;;  %v301_v22 = vsel %vm225_vm8, %v224_v18, 2147483648  ;;  %v259_v44 = vcvt.s32.f32 %v257_v38 }
 0x128   :  { %217 = vst.msk [vmem:[#allocation5 + $0x8] sm:$0x3] %vm212_vm1, %v210_v20  ;;  %v223_v23 = vunpack.c.0.s8 %v210_v20  ;;  %v303_v24 = vshra.s32 %v301_v22, 16  ;;  %v302_v41 = vand.u32 65535, %v301_v22 }
 0x129   :  { %261 = vmax.xlane.f32.xlu0 %v260_v21 }
 0x12a   :  { %v305_v25 = vcvt.s32.f32 %v303_v24  ;;  %v286_v26 = vsel %vm225_vm8, %v223_v23, 2147483648  ;;  %v304_v48 = vcvt.s32.f32 %v302_v41 }
 0x12b   :  { %v288_v27 = vshra.s32 %v286_v26, 16  ;;  %v287_v46 = vand.u32 65535, %v286_v26 }
 0x12c   :  { %306 = vmax.xlane.f32.xlu1 %v305_v25 }
 0x12d   :  { %v290_v28 = vcvt.s32.f32 %v288_v27  ;;  %v289_v51 = vcvt.s32.f32 %v287_v46 }
 0x12f   :  { %291 = vmax.xlane.f32.xlu0 %v290_v28 }
 0x1ac   :  { %v232_v30 = vpop.xlane.xlu1 %231 }
 0x1ad   :  { %vm233_vm15 = vcmp.eq.f32.partialorder %v230_v0, %v232_v30 }
 0x1ae   :  { %v234_v33 = vsel %vm233_vm15, %v229_v31, -inf }
 0x1af   :  { %235 = vmax.xlane.f32.xlu0 %v234_v33 }
 0x1b1   :  { %v247_v34 = vpop.xlane.xlu0 %246 }
 0x1b2   :  { %vm248_vm0 = vcmp.eq.f32.partialorder %v245_v10, %v247_v34 }
 0x1b3   :  { %v249_v37 = vsel %vm248_vm0, %v244_v35, -inf  ;;  %v277_v39 = vpop.xlane.xlu1 %276 }
 0x1b4   :  { %250 = vmax.xlane.f32.xlu1 %v249_v37  ;;  %vm278_vm1 = vcmp.eq.f32.partialorder %v275_v16, %v277_v39 }
 0x1b5   :  { %v279_v43 = vsel %vm278_vm1, %v274_v40, -inf }
 0x1b6   :  { %v262_v42 = vpop.xlane.xlu0 %261 }
 0x1b7   :  { %vm263_vm8 = vcmp.eq.f32.partialorder %v260_v21, %v262_v42 }
 0x1b8   :  { %280 = vmax.xlane.f32.xlu1 %v279_v43  ;;  %v264_v45 = vsel %vm263_vm8, %v259_v44, -inf }
 0x1b9   :  { %v307_v47 = vpop.xlane.xlu1 %306  ;;  %265 = vmax.xlane.f32.xlu0 %v264_v45 }
 0x1ba   :  { %vm308_vm14 = vcmp.eq.f32.partialorder %v305_v25, %v307_v47 }
 0x1bb   :  { %v309_v49 = vsel %vm308_vm14, %v304_v48, -inf }
 0x1bc   :  { %v292_v50 = vpop.xlane.xlu0 %291  ;;  %310 = vmax.xlane.f32.xlu1 %v309_v49 }
 0x1bd   :  { %vm293_vm7 = vcmp.eq.f32.partialorder %v290_v28, %v292_v50 }
 0x1be   :  { %v294_v52 = vsel %vm293_vm7, %v289_v51, -inf }
 0x1bf   :  { %295 = vmax.xlane.f32.xlu0 %v294_v52 }
 0x1c0   :  { %438 = shalt.err (!%p435_p12)
}
 0x1c1   :  { %s439_s15 = scalar_lea.hbm %s693_s2, 192 }
 0x1c2   :  { %p440_p13 = scmp.ne.s32.totalorder %s693_s2, %s439_s15  ;;  %p443_p0 = scmp.lt.u32.totalorder %s439_s15, %s693_s2 }
 0x1c4   :  { %p445_p1 = pnand %p443_p0, %p440_p13 }
 0x1c6   :  { %448 = shalt.err (!%p445_p1)
}
 0x1c7   :  { %381 = dma.vmem_to_hbm [thread:$0]  %s376_s11, 192, %s693_s2, [#allocation4], %s454_s22, %s454_s22, %s455_s23   ;;  %v238_v53 = vcvt.f32.s32 %v232_v30  ;;  %v253_v54 = vcvt.f32.s32 %v247_v34  ;;  %v283_v59 = vcvt.f32.s32 %v277_v39  ;;  %v268_v61 = vcvt.f32.s32 %v262_v42 }
 0x1c8   :  { %v313_v7 = vcvt.f32.s32 %v307_v47  ;;  %v298_v11 = vcvt.f32.s32 %v292_v50  ;;  %v357_v27 = vld [vmem:[%s694_s3] sm:$0x1]  ;;  %v358_v36 = vld [vmem:[%s694_s3 + $0x1] sm:$0x1]  ;;  %v359_v43 = vld [vmem:[%s694_s3 + $0x2] sm:$0x1] }
 0x1c9   :  { %v239_v57 = vshll.u32 %v238_v53, 16  ;;  %v254_v58 = vshll.u32 %v253_v54, 16  ;;  %v284_v2 = vshll.u32 %v283_v59, 16  ;;  %v269_v4 = vshll.u32 %v268_v61, 16 }
 0x1ca   :  { %v314_v16 = vshll.u32 %v313_v7, 16  ;;  %v299_v18 = vshll.u32 %v298_v11, 16 }
 0x23c   :  { %v236_v1 = vpop.xlane.xlu0 %235 }
 0x23d   :  { %v237_v55 = vcvt.f32.s32 %v236_v1 }
 0x23f   :  { %v240_v62 = vadd.s32 %v239_v57, %v237_v55 }
 0x241   :  { %v251_v56 = vpop.xlane.xlu1 %250 }
 0x242   :  { %v252_v60 = vcvt.f32.s32 %v251_v56 }
 0x244   :  { %v255_v63 = vadd.s32 %v254_v58, %v252_v60 }
 0x245   :  { %v281_v0 = vpop.xlane.xlu1 %280 }
 0x246   :  { %vm316_vm11 = vcmp.gt.s32.totalorder %v240_v62, %v255_v63  ;;  %v282_v3 = vcvt.f32.s32 %v281_v0  ;;  %v266_v6 = vpop.xlane.xlu0 %265 }
 0x247   :  { %v317_v5 = vsel %vm316_vm11, %v240_v62, %v255_v63  ;;  %v267_v10 = vcvt.f32.s32 %v266_v6 }
 0x248   :  { %v318_v8 = vrot.slane %v317_v5, 4  ;;  %v285_v9 = vadd.s32 %v284_v2, %v282_v3 }
 0x249   :  { %v270_v12 = vadd.s32 %v269_v4, %v267_v10  ;;  %v311_v13 = vpop.xlane.xlu1 %310 }
 0x24a   :  { %vm319_vm3 = vcmp.gt.s32.totalorder %v317_v5, %v318_v8  ;;  %v312_v15 = vcvt.f32.s32 %v311_v13 }
 0x24b   :  { %v320_v14 = vsel %vm319_vm3, %v317_v5, %v318_v8  ;;  %vm327_vm12 = vcmp.gt.s32.totalorder %v270_v12, %v285_v9 }
 0x24c   :  { %v321_v17 = vrot.slane %v320_v14, 2  ;;  %v328_v19 = vsel %vm327_vm12, %v270_v12, %v285_v9  ;;  %v296_v20 = vpop.xlane.xlu0 %295  ;;  %v315_v22 = vadd.s32 %v314_v16, %v312_v15 }
 0x24d   :  { %v329_v21 = vrot.slane %v328_v19, 4  ;;  %v297_v23 = vcvt.f32.s32 %v296_v20 }
 0x24e   :  { %vm322_vm13 = vcmp.gt.s32.totalorder %v320_v14, %v321_v17 }
 0x24f   :  { %v323_v24 = vsel %vm322_vm13, %v320_v14, %v321_v17  ;;  %vm330_vm6 = vcmp.gt.s32.totalorder %v328_v19, %v329_v21  ;;  %v300_v26 = vadd.s32 %v299_v18, %v297_v23 }
 0x250   :  { %v324_v25 = vrot.slane %v323_v24, 1  ;;  %v331_v28 = vsel %vm330_vm6, %v328_v19, %v329_v21 }
 0x251   :  { %v332_v29 = vrot.slane %v331_v28, 2  ;;  %vm338_vm9 = vcmp.gt.s32.totalorder %v300_v26, %v315_v22 }
 0x252   :  { %vm325_vm4 = vcmp.gt.s32.totalorder %v323_v24, %v324_v25  ;;  %v339_v31 = vsel %vm338_vm9, %v300_v26, %v315_v22 }
 0x253   :  { %v326_v30 = vsel %vm325_vm4, %v323_v24, %v324_v25  ;;  %vm333_vm5 = vcmp.gt.s32.totalorder %v331_v28, %v332_v29  ;;  %v340_v32 = vrot.slane %v339_v31, 4 }
 0x254   :  { %vm360_vm10 = vcmp.gt.s32.totalorder %v357_v27, %v326_v30  ;;  %v334_v34 = vsel %vm333_vm5, %v331_v28, %v332_v29 }
 0x255   :  { %v361_v33 = vsel %vm360_vm10, %v357_v27, %v326_v30  ;;  %v335_v35 = vrot.slane %v334_v34, 1  ;;  %vm341_vm15 = vcmp.gt.s32.totalorder %v339_v31, %v340_v32 }
 0x256   :  { %367 = vst.msk [vmem:[%s694_s3] sm:$0x1] %vm353_vm2, %v361_v33  ;;  %v342_v37 = vsel %vm341_vm15, %v339_v31, %v340_v32 }
 0x257   :  { %vm336_vm0 = vcmp.gt.s32.totalorder %v334_v34, %v335_v35  ;;  %v343_v38 = vrot.slane %v342_v37, 2 }
 0x258   :  { %v337_v39 = vsel %vm336_vm0, %v334_v34, %v335_v35 }
 0x259   :  { %vm362_vm1 = vcmp.gt.s32.totalorder %v358_v36, %v337_v39  ;;  %vm344_vm8 = vcmp.gt.s32.totalorder %v342_v37, %v343_v38 }
 0x25a   :  { %v363_v40 = vsel %vm362_vm1, %v358_v36, %v337_v39  ;;  %v345_v41 = vsel %vm344_vm8, %v342_v37, %v343_v38 }
 0x25b   :  { %368 = vst.msk [vmem:[%s694_s3 + $0x1] sm:$0x1] %vm353_vm2, %v363_v40  ;;  %v346_v42 = vrot.slane %v345_v41, 1 }
 0x25d   :  { %vm347_vm14 = vcmp.gt.s32.totalorder %v345_v41, %v346_v42 }
 0x25e   :  { %v348_v44 = vsel %vm347_vm14, %v345_v41, %v346_v42 }
 0x25f   :  { %vm364_vm7 = vcmp.gt.s32.totalorder %v359_v43, %v348_v44 }
 0x260   :  { %v365_v45 = vsel %vm364_vm7, %v359_v43, %v348_v44 }
 0x261   :  { %369 = vst.msk [vmem:[%s694_s3 + $0x2] sm:$0x1] %vm353_vm2, %v365_v45 }
 0x262   :  { %451 = dma.done.wait [#allocation4], 192  }
 0x263   :  { %452 = vsyncadd [#allocation4], 4294967104 }
 0x264   :  { %389 = vsyncpa [#allocation3], 1 }
 0x265   :  { %390 = vsyncpa [#allocation4], 1 }

</bundles_post_ra>
